<compile_context>
chip_gen: v5e
topology: v5e:2x2
jax: 0.10.0
libtpu: 0.0.40
codegen_flags: <defaults>
</compile_context>

<pallas_src>
import functools

import jax
import jax.numpy as jnp
from jax.experimental import pallas as pl
from jax.experimental.pallas import tpu as pltpu


def _l1_partial_kernel(fake_ref, real_ref, out_ref, *, rows_valid, tile_rows):
    """Per-tile lane-parallel partial sums of |fake - real|.

    Each grid step writes its own (1, 8, 128) partial, so the grid axis is
    fully parallel and the final (tiny) reduction happens in the wrapper.
    """
    step = pl.program_id(0)

    f = fake_ref[...].astype(jnp.float32)
    r = real_ref[...].astype(jnp.float32)
    diff = jnp.abs(f - r)

    def _store(d):
        # Fold sublane groups together -> (8, 128) lane-parallel partial.
        out_ref[...] = (d.reshape(tile_rows // 8, 8, 128)
                        .sum(axis=0)
                        .reshape(1, 8, 128))

    if rows_valid % tile_rows != 0:
        last = pl.num_programs(0) - 1

        @pl.when(step != last)
        def _fast():
            _store(diff)

        @pl.when(step == last)
        def _masked():
            # Mask rows past the end of the image slab.  The mask is applied
            # to `diff` BEFORE the reduction so Pallas' OOB garbage in the
            # ragged last block never reaches a sum.
            row_id = (jax.lax.broadcasted_iota(jnp.int32, diff.shape, 0)
                      + step * tile_rows)
            _store(jnp.where(row_id < rows_valid, diff, 0.0))
    else:
        _store(diff)


def _bce_ones_kernel(pred_ref, out_ref, *, n_pred):
    """mean(BCEWithLogits(pred, ones)) == mean(softplus(-pred)), stable form."""
    x = pred_ref[...].astype(jnp.float32)
    bce = jnp.maximum(x, 0.0) - x + jnp.log1p(jnp.exp(-jnp.abs(x)))
    rp, lp = x.shape
    if n_pred != rp * lp:  # mask the zero-pad: bce(0) = log(2), not 0
        flat_id = (jax.lax.broadcasted_iota(jnp.int32, (rp, lp), 0) * lp
                   + jax.lax.broadcasted_iota(jnp.int32, (rp, lp), 1))
        bce = jnp.where(flat_id < n_pred, bce, 0.0)
    out_ref[0, 0] = jnp.sum(bce) / jnp.float32(n_pred)


def _round_up(x, m):
    return (x + m - 1) // m * m


def _to_rows128(x):
    """Flatten to (rows, 128).  A copy is only made when numel % 128 != 0."""
    flat = x.reshape(-1)
    n = flat.shape[0]
    pad = (-n) % 128
    if pad:
        # TODO(synk): ragged (numel % 128 != 0) inputs pay one pad copy; could
        # be removed with unpadded 1-D blocks + full in-kernel masking.
        flat = jnp.pad(flat, (0, pad))
    return flat.reshape(-1, 128), n


@functools.partial(jax.jit, static_argnames=("tile_rows",))
def gloss(fake, real, fake_pred, alpha=100, tile_rows=8192):
    assert fake.shape == real.shape
    fake2d, n_img = _to_rows128(fake)
    real2d, _ = _to_rows128(real)
    pred2d, n_pred = _to_rows128(fake_pred)

    rows_img = fake2d.shape[0]
    rows_pred = pred2d.shape[0]
    itemsize = jnp.dtype(fake2d.dtype).itemsize

    # Tile size: big enough to amortize per-step grid overhead, small enough
    # that 2 streams x 2 pipeline buffers stay under ~40 MiB (v7x: 64 MiB
    # VMEM per TensorCore).
    max_tm = max(8, ((40 * 1024 * 1024) // (4 * 128 * itemsize)) // 8 * 8)
    tm = max(8, min(tile_rows, max_tm, _round_up(rows_img, 8)))
    num_tiles = pl.cdiv(rows_img, tm)

    l1_partials = pl.pallas_call(
        functools.partial(_l1_partial_kernel, rows_valid=rows_img,
                          tile_rows=tm),
        out_shape=jax.ShapeDtypeStruct((num_tiles, 8, 128), jnp.float32),
        grid=(num_tiles,),
        in_specs=[
            pl.BlockSpec((tm, 128), lambda i: (i, 0)),
            pl.BlockSpec((tm, 128), lambda i: (i, 0)),
        ],
        out_specs=pl.BlockSpec((1, 8, 128), lambda i: (i, 0, 0)),
        compiler_params=pltpu.CompilerParams(
            dimension_semantics=("parallel",),
            vmem_limit_bytes=48 * 1024 * 1024,
        ),
        cost_estimate=pl.CostEstimate(
            flops=3 * n_img,
            transcendentals=0,
            bytes_accessed=2 * n_img * itemsize + num_tiles * 8 * 128 * 4),
    )(fake2d, real2d)

    # Tiny one-shot kernel for the discriminator-logit BCE term (pred is
    # small, so a single resident block suffices).
    bce = pl.pallas_call(
        functools.partial(_bce_ones_kernel, n_pred=n_pred),
        out_shape=jax.ShapeDtypeStruct((1, 1), jnp.float32),
        grid=(1,),
        in_specs=[pl.BlockSpec((rows_pred, 128), lambda i: (0, 0))],
        out_specs=pl.BlockSpec(memory_space=pltpu.SMEM),
    )(pred2d)

    l1_mean = jnp.sum(l1_partials) / jnp.float32(n_img)
    return bce[0, 0] + jnp.asarray(alpha, jnp.float32) * l1_mean


def gloss_ref(fake, real, fake_pred, alpha=100):
    x = fake_pred.astype(jnp.float32)
    bce = jnp.mean(jnp.maximum(x, 0.0) - x + jnp.log1p(jnp.exp(-jnp.abs(x))))
    l1 = jnp.mean(jnp.abs(fake.astype(jnp.float32) - real.astype(jnp.float32)))
    return bce + alpha * l1


if __name__ == "__main__":
    key = jax.random.PRNGKey(0)
    k1, k2, k3, k4, k5, k6 = jax.random.split(key, 6)

    # NCHW shapes consistent with a GAN generator/discriminator pair.
    fake = jax.random.normal(k1, (2, 4, 16, 16), dtype=jnp.float32)
    real = jax.random.normal(k2, (2, 4, 16, 16), dtype=jnp.float32)
    fake_pred = jax.random.normal(k3, (2, 1, 16, 16), dtype=jnp.float32)

    loss = gloss(fake, real, fake_pred, alpha=100)
    loss = jax.block_until_ready(loss)
    ref = gloss_ref(fake, real, fake_pred, alpha=100)
    assert jnp.allclose(loss, ref, rtol=1e-5, atol=1e-5), (loss, ref)

    # Ragged sizes (not multiples of 128): exercises the masked-last-tile L1
    # path and the masked BCE mean.
    fake2 = jax.random.normal(k4, (2, 3, 17, 17), dtype=jnp.float32)
    real2 = jax.random.normal(k5, (2, 3, 17, 17), dtype=jnp.float32)
    pred2 = jax.random.normal(k6, (2, 1, 15, 15), dtype=jnp.float32)
    loss2 = jax.block_until_ready(gloss(fake2, real2, pred2, alpha=100))
    ref2 = gloss_ref(fake2, real2, pred2, alpha=100)
    assert jnp.allclose(loss2, ref2, rtol=1e-5, atol=1e-5), (loss2, ref2)

    print("KERNEL_OK")
</pallas_src>

<mosaic_0001>
module attributes {stable_mosaic.version = 11 : i64} {
  func.func @_bce_ones_kernel(%arg0: i32, %arg1: memref<4x128xf32, #tpu.memory_space<vmem>>, %arg2: memref<1x1xf32, #tpu.memory_space<smem>>) attributes {dimension_semantics = [#tpu.dimension_semantics<arbitrary>], iteration_bounds = array<i64: 1>, scalar_prefetch = 0 : i64, scratch_operands = 0 : i64, tpu.core_type = #tpu.core_type<tc>, window_params = [{pipeline_mode = #tpu.pipeline_mode<synchronous>, transform_indices = @transform_0, window_bounds = array<i64: 4, 128>}, {transform_indices = @transform_1, window_bounds = array<i64: 1, 1>}]} {
    %c0 = arith.constant 0 : index
    %c0_0 = arith.constant 0 : index
    %0 = vector.load %arg1[%c0, %c0_0] : memref<4x128xf32, #tpu.memory_space<vmem>>, vector<4x128xf32>
    %cst = arith.constant 0.000000e+00 : f32
    %1 = vector.broadcast %cst : f32 to vector<4x128xf32>
    %2 = arith.maximumf %0, %1 : vector<4x128xf32>
    %3 = arith.subf %2, %0 : vector<4x128xf32>
    %4 = math.absf %0 : vector<4x128xf32>
    %cst_1 = arith.constant 0.000000e+00 : f32
    %5 = vector.broadcast %cst_1 : f32 to vector<4x128xf32>
    %6 = arith.subf %5, %4 : vector<4x128xf32>
    %7 = math.exp %6 : vector<4x128xf32>
    %8 = math.log1p %7 : vector<4x128xf32>
    %9 = arith.addf %3, %8 : vector<4x128xf32>
    %10 = vector.shape_cast %9 : vector<4x128xf32> to vector<1x4x128xf32>
    %cst_2 = arith.constant dense<0.000000e+00> : vector<1xf32>
    %11 = vector.multi_reduction <add>, %10, %cst_2 [1, 2] : vector<1x4x128xf32> to vector<1xf32>
    %12 = vector.shape_cast %11 : vector<1xf32> to vector<1x1x1xf32>
    %13 = vector.extract %12[0, 0, 0] : f32 from vector<1x1x1xf32>
    %cst_3 = arith.constant 5.120000e+02 : f32
    %14 = arith.divf %13, %cst_3 : f32
    %c0_4 = arith.constant 0 : index
    %c0_5 = arith.constant 0 : index
    %15 = memref.load %arg2[%c0_4, %c0_5] : memref<1x1xf32, #tpu.memory_space<smem>>
    memref.store %14, %arg2[%c0_4, %c0_5] : memref<1x1xf32, #tpu.memory_space<smem>>
    return
  }
  func.func @transform_0(%arg0: i32) -> (i32, i32) {
    %c0_i32 = arith.constant 0 : i32
    %c0_i32_0 = arith.constant 0 : i32
    %c0_i32_1 = arith.constant 0 : i32
    return %c0_i32, %c0_i32_0 : i32, i32
  }
  func.func @transform_1(%arg0: i32) -> (i32, i32) {
    %c0_i32 = arith.constant 0 : i32
    %c0_i32_0 = arith.constant 0 : i32
    %c0_i32_1 = arith.constant 0 : i32
    return %c0_i32, %c0_i32_0 : i32, i32
  }
}

module attributes {stable_mosaic.version = 11 : i64} {
  func.func @_l1_partial_kernel(%arg0: i32, %arg1: memref<16x128xf32, #tpu.memory_space<vmem>>, %arg2: memref<16x128xf32, #tpu.memory_space<vmem>>, %arg3: memref<1x8x128xf32, #tpu.memory_space<vmem>>) attributes {dimension_semantics = [#tpu.dimension_semantics<parallel>], iteration_bounds = array<i64: 1>, scalar_prefetch = 0 : i64, scratch_operands = 0 : i64, tpu.core_type = #tpu.core_type<tc>, window_params = [{transform_indices = @transform_0, window_bounds = array<i64: 16, 128>}, {transform_indices = @transform_1, window_bounds = array<i64: 16, 128>}, {transform_indices = @transform_2, window_bounds = array<i64: 1, 8, 128>}]} {
    %c0 = arith.constant 0 : index
    %c0_0 = arith.constant 0 : index
    %0 = vector.load %arg1[%c0, %c0_0] : memref<16x128xf32, #tpu.memory_space<vmem>>, vector<16x128xf32>
    %c0_1 = arith.constant 0 : index
    %c0_2 = arith.constant 0 : index
    %1 = vector.load %arg2[%c0_1, %c0_2] : memref<16x128xf32, #tpu.memory_space<vmem>>, vector<16x128xf32>
    %2 = arith.subf %0, %1 : vector<16x128xf32>
    %3 = math.absf %2 : vector<16x128xf32>
    %4 = vector.shape_cast %3 : vector<16x128xf32> to vector<2x8x128xf32>
    %cst = arith.constant dense<0.000000e+00> : vector<8x128xf32>
    %5 = vector.multi_reduction <add>, %4, %cst [0] : vector<2x8x128xf32> to vector<8x128xf32>
    %6 = vector.shape_cast %5 : vector<8x128xf32> to vector<1x8x128xf32>
    %c0_3 = arith.constant 0 : index
    %c0_4 = arith.constant 0 : index
    %c0_5 = arith.constant 0 : index
    %7 = vector.load %arg3[%c0_3, %c0_4, %c0_5] : memref<1x8x128xf32, #tpu.memory_space<vmem>>, vector<1x8x128xf32>
    tpu.vector_store %arg3[%c0_3, %c0_4, %c0_5], %6 {strides = array<i32>} : memref<1x8x128xf32, #tpu.memory_space<vmem>>, vector<1x8x128xf32>,
    return
  }
  func.func @transform_0(%arg0: i32) -> (i32, i32) {
    %c0_i32 = arith.constant 0 : i32
    %c0_i32_0 = arith.constant 0 : i32
    return %arg0, %c0_i32 : i32, i32
  }
  func.func @transform_1(%arg0: i32) -> (i32, i32) {
    %c0_i32 = arith.constant 0 : i32
    %c0_i32_0 = arith.constant 0 : i32
    return %arg0, %c0_i32 : i32, i32
  }
  func.func @transform_2(%arg0: i32) -> (i32, i32, i32) {
    %c0_i32 = arith.constant 0 : i32
    %c0_i32_0 = arith.constant 0 : i32
    %c0_i32_1 = arith.constant 0 : i32
    return %arg0, %c0_i32, %c0_i32_0 : i32, i32, i32
  }
}

</mosaic_0001>

<bundles_post_ra>
// kernel: gloss.3
= control target key start
LH: loop header
LB: loop body
LE: loop exit
PB: predicated region body
PF: predicated region fallthrough
CT: control target
= control target key end

     0   :  { %s107_s0 = inlined_call_operand.vmem [shape: f32[4,128], index: 0, kind: input, shape index: {}]   ;;  %s108_s1 = inlined_call_operand.hbm [shape: f32[1,1], index: 1, kind: output, shape index: {}]  }
   0x1   :  { %v9_v0 = vld [vmem:[%s107_s0] sm:$0xf] }
   0x2   :  { %6 = vsyncpa [#allocation3], 0  ;;  %v12_v1 = vand.u32 2147483647, %v9_v0  ;;  %v10_v8 = vmax.f32 %v9_v0, 0.0  ;;  %vm26_vm1 = vcmask 1043456  }
   0x3   :  { %v89_v17 = vmov 512.0   ;;  %s53_s9 = sshll.u32 %s108_s1, 4  ;;  %s90_s13 = smov [#allocation2]   ;;  %s54_s9 = int_to_ptr.hbm [resolvable:$true] %s53_s9 }
   0x4   :  { %v13_v2 = vsub.f32 0.0, %v12_v1  ;;  %v11_v12 = vsub.f32 %v10_v8, %v9_v0 }
   0x6   :  { %v14_v3 = vmul.f32 1.442695, %v13_v2 }
   0x8   :  { %69 = vpow2.f32 %v14_v3 }
   0xe   :  { %v70_v4 = vpop.eup %69 }
   0xf   :  { %v16_v5 = vadd.f32 1.0, %v70_v4  ;;  %v19_v6 = vmul.f32 -0.5, %v70_v4  ;;  %v22_v9 = vand.u32 2147483647, %v70_v4 }
  0x11   :  { %71 = vlog2.f32 %v16_v5  ;;  %v20_v7 = vadd.f32 1.0, %v19_v6  ;;  %vm23_vm0 = vcmp.lt.f32.partialorder %v22_v9, 0.0004427343 }
  0x12   :  { %73 = vrcp.f32 %v89_v17 }
  0x13   :  { %v21_v10 = vmul.f32 %v70_v4, %v20_v7 }
  0x17   :  { %v72_v11 = vpop.eup %71 }
  0x18   :  { %v18_v13 = vmul.f32 0.6931472, %v72_v11  ;;  %v74_v18 = vpop.eup %73 }
  0x19   :  { %v38_v19 = vmul.f32 512.0, %v74_v18  ;;  %vm42_vm2 = vweird.f32 %v74_v18 }
  0x1a   :  { %v24_v14 = vsel %vm23_vm0, %v21_v10, %v18_v13 }
  0x1b   :  { %v25_v15 = vadd.f32 %v24_v14, %v11_v12  ;;  %v39_v20 = vsub.f32 1.0, %v38_v19 }
  0x1d   :  { %v27_v16 = vsel %vm26_vm1, %v25_v15, 0.0  ;;  %v40_v24 = vmul.f32 %v74_v18, %v39_v20 }
  0x1e   :  { %28 = vadd.xlane.f32.xlu0 %v27_v16 }
  0x1f   :  { %v41_v27 = vadd.f32 %v74_v18, %v40_v24 }
  0x21   :  { %v43_v30 = vsel %vm42_vm2, %v74_v18, %v41_v27 }
  0x91   :  { %v29_v21 = vpop.xlane.xlu0 %28 }
  0x92   :  { %v30_v22 = vrot.slane %v29_v21, 4 }
  0x94   :  { %v31_v23 = vadd.f32 %v30_v22, %v29_v21 }
  0x96   :  { %v32_v25 = vrot.slane %v31_v23, 2 }
  0x98   :  { %v33_v26 = vadd.f32 %v32_v25, %v31_v23 }
  0x9a   :  { %v34_v28 = vrot.slane %v33_v26, 1 }
  0x9c   :  { %v35_v29 = vadd.f32 %v34_v28, %v33_v26 }
  0x9e   :  { %63 = vpush %v35_v29 }
  0x9f   :  { %65 = vpush %v43_v30 }
  0xcf   :  { %s64_s10 = spop %63 }
  0xd0   :  { %s66_s11 = spop %65 }
  0xd1   :  { %s45_s12 = smul.f32 %s66_s11, %s64_s10 }
  0xd3   :  { %47 = sst [smem:[#allocation2]] %s45_s12 }
  0xd4   :  { %56 = dma.smem_to_hbm %s90_s13, 16, %s54_s9, [#allocation3]  }
  0xd5   :  { %87 = dma.done.wait [#allocation3], 16  }
  0xd6   :  { %88 = vsyncadd [#allocation3], 4294967280 }
  0xd7   :  { %61 = sfence }
  0xd8   :  { %62 = vsyncpa [#allocation3], 1 }

// kernel: gloss.2
= control target key start
LH: loop header
LB: loop body
LE: loop exit
PB: predicated region body
PF: predicated region fallthrough
CT: control target
= control target key end

     0   :  { %s55_s0 = inlined_call_operand.vmem [shape: f32[16,128], index: 0, kind: input, shape index: {}]   ;;  %s56_s1 = inlined_call_operand.vmem [shape: f32[16,128], index: 1, kind: input, shape index: {}]   ;;  %s57_s2 = inlined_call_operand.vmem [shape: f32[1,8,128], index: 2, kind: output, shape index: {}]  }
   0x1   :  { %v11_v0 = vld [vmem:[%s55_s0] sm:$0xff]  ;;  %v12_v1 = vld [vmem:[%s55_s0 + $0x8] sm:$0xff] }
   0x2   :  { %v13_v2 = vld [vmem:[%s56_s1] sm:$0xff]  ;;  %v14_v3 = vld [vmem:[%s56_s1 + $0x8] sm:$0xff] }
   0x3   :  { %v15_v4 = vsub.f32 %v11_v0, %v13_v2  ;;  %v16_v5 = vsub.f32 %v12_v1, %v14_v3 }
   0x5   :  { %v17_v6 = vand.u32 2147483647, %v15_v4  ;;  %v18_v7 = vand.u32 2147483647, %v16_v5 }
   0x7   :  { %v19_v8 = vadd.f32 %v18_v7, %v17_v6 }
   0x9   :  { %20 = vst [vmem:[%s57_s2] sm:$0xff] %v19_v8 }

</bundles_post_ra>
